<compile_context>
chip_gen: v6e
topology: v6e:2x2x1
jax: 0.10.0
libtpu: 0.0.40
codegen_flags: <defaults>
</compile_context>

<pallas_src>
import math

import jax
import jax.numpy as jnp
from jax.experimental import pallas as pl
from jax.experimental.pallas import tpu as pltpu

H_PAD = 256  # hidden widths (200) padded to a lane-exact 256


def _round_up(v, m):
    return ((v + m - 1) // m) * m


def _spectrum_kernel(x_ref, w1_ref, b1_ref, w2_ref, b2_ref, w3_ref, b3_ref,
                     o_ref):
    # x arrives as f32; cast to bf16 in-kernel (free VPU work under MXU slack).
    x = x_ref[...].astype(jnp.bfloat16)

    # Layer 1: bf16 MXU matmul, f32 accumulation; bias + ReLU in f32 (VPU).
    h = jnp.dot(x, w1_ref[...], preferred_element_type=jnp.float32)
    h = jnp.maximum(h + b1_ref[...], 0.0)

    # Layer 2: cast activation to bf16 only for the MXU input.
    h = jnp.dot(h.astype(jnp.bfloat16), w2_ref[...],
                preferred_element_type=jnp.float32)
    h = jnp.maximum(h + b2_ref[...], 0.0)

    # Layer 3: [Bt,256] x [256,1] would light up 1 of 256 MXU columns, so do it
    # on the VPU (broadcast multiply) + XLU (lane reduction) instead.
    # Ragged-tail note: rows of the last (partial) block beyond B are undefined,
    # but every output row depends only on its own input row and the masked
    # writeback drops them -- do NOT add any batch-wide reduction here.
    out = jnp.sum(h * w3_ref[...], axis=-1, keepdims=True) + b3_ref[...]
    o_ref[...] = out.astype(o_ref.dtype)


def _reference_forward(x, params):
    """Plain-XLA path with the same mixed precision as the kernel."""
    w1, b1, w2, b2, w3, b3 = params
    h = jnp.dot(x.astype(jnp.bfloat16), w1,
                preferred_element_type=jnp.float32) + b1
    h = jnp.maximum(h, 0.0)
    h = jnp.dot(h.astype(jnp.bfloat16), w2,
                preferred_element_type=jnp.float32) + b2
    h = jnp.maximum(h, 0.0)
    return jnp.sum(h * w3, axis=-1, keepdims=True) + b3


def spectrum_forward(x, params, *, block_batch=2048, min_pallas_batch=256,
                     force_pallas=False):
    """x: [B, state_dim] float32 -> [B, 1] float32."""
    w1, b1, w2, b2, w3, b3 = params
    B, D = x.shape
    h_pad = w1.shape[1]

    # Small-batch fast path: one grid step of fixed pipeline overhead swamps
    # the tiny FLOP count -- let XLA's fused GEMM handle it.
    if B < min_pallas_batch and not force_pallas:
        return _reference_forward(x, params)

    # Choose the batch tile: large tiles amortize the ~0.35 us/step overhead;
    # when B fits in a single tile but is big enough, split into >=2 steps so
    # v7x's second TensorCore engages on the "parallel" grid axis.
    bt = block_batch
    if B <= bt:
        if B >= 512:
            bt = _round_up(pl.cdiv(B, 2), 256)
        else:
            bt = _round_up(B, 8)
    grid_steps = pl.cdiv(B, bt)

    flops = 2 * B * (D * h_pad + h_pad * h_pad + h_pad)
    bytes_accessed = (x.size * 4 + w1.size * 2 + w2.size * 2
                      + (b1.size + b2.size + w3.size + b3.size) * 4 + B * 4)

    out = pl.pallas_call(
        _spectrum_kernel,
        out_shape=jax.ShapeDtypeStruct((B, 1), jnp.float32),
        grid=(grid_steps,),
        in_specs=[
            pl.BlockSpec((bt, D), lambda i: (i, 0)),          # x: pipelined tile
            pl.BlockSpec((D, h_pad), lambda i: (0, 0)),       # w1: resident
            pl.BlockSpec((1, h_pad), lambda i: (0, 0)),       # b1: resident
            pl.BlockSpec((h_pad, h_pad), lambda i: (0, 0)),   # w2: resident
            pl.BlockSpec((1, h_pad), lambda i: (0, 0)),       # b2: resident
            pl.BlockSpec((1, h_pad), lambda i: (0, 0)),       # w3 row: resident
            pl.BlockSpec((1, 1), lambda i: (0, 0)),           # b3: resident
        ],
        out_specs=pl.BlockSpec((bt, 1), lambda i: (i, 0)),
        compiler_params=pltpu.CompilerParams(
            dimension_semantics=("parallel",)),               # megacore on v7x
        cost_estimate=pl.CostEstimate(flops=flops, transcendentals=0,
                                      bytes_accessed=bytes_accessed),
    )(x, w1, b1, w2, b2, w3, b3)
    return out


def init_params(key, state_dim, h1=200, h2=200, h_pad=H_PAD):
    """nn.Linear-style init (U[-1/sqrt(fan_in), 1/sqrt(fan_in)]) with the true
    hidden widths, then zero-padded to h_pad so the padded units are inert."""
    ks = jax.random.split(key, 6)

    def unif(k, shape, fan_in):
        bound = 1.0 / math.sqrt(float(fan_in))
        return jax.random.uniform(k, shape, jnp.float32, -bound, bound)

    w1 = unif(ks[0], (state_dim, h1), state_dim)
    b1 = unif(ks[1], (1, h1), state_dim)
    w2 = unif(ks[2], (h1, h2), h1)
    b2 = unif(ks[3], (1, h2), h1)
    w3 = unif(ks[4], (h2, 1), h2)
    b3 = unif(ks[5], (1, 1), h2)

    # Zero-pad hidden dims: padded layer-1/2 units produce ReLU(0 + 0) = 0 and
    # their downstream weights are 0, so the math is bit-identical.
    w1p = jnp.zeros((state_dim, h_pad), jnp.float32).at[:, :h1].set(w1)
    b1p = jnp.zeros((1, h_pad), jnp.float32).at[:, :h1].set(b1)
    w2p = jnp.zeros((h_pad, h_pad), jnp.float32).at[:h1, :h2].set(w2)
    b2p = jnp.zeros((1, h_pad), jnp.float32).at[:, :h2].set(b2)
    w3p = jnp.zeros((1, h_pad), jnp.float32).at[:, :h2].set(w3[:, 0])

    # MXU weights in bf16; biases and the VPU-path w3 row stay f32.
    return (w1p.astype(jnp.bfloat16), b1p,
            w2p.astype(jnp.bfloat16), b2p,
            w3p, b3)


if __name__ == "__main__":
    key = jax.random.PRNGKey(0)
    k_param, k_x1, k_x2 = jax.random.split(key, 3)

    batch, state_dim = 8, 32
    params = init_params(k_param, state_dim, h1=200, h2=200)

    # 1) tiny batch (module-sized demo): force the Pallas path so the kernel
    #    itself (single ragged block) is exercised rather than the fast path.
    x_small = jax.random.normal(k_x1, (batch, state_dim), jnp.float32)
    out_small = spectrum_forward(x_small, params, force_pallas=True)
    jax.block_until_ready(out_small)
    ref_small = _reference_forward(x_small, params)
    assert out_small.shape == (batch, 1)
    assert jnp.allclose(out_small, ref_small, atol=1e-4, rtol=1e-4), (
        float(jnp.max(jnp.abs(out_small - ref_small))))

    # 2) a still-small batch spanning >= 2 grid steps with a ragged tail, to
    #    exercise multi-step pipelining + masked writeback of the last block.
    x_multi = jax.random.normal(k_x2, (520, state_dim), jnp.float32)
    out_multi = spectrum_forward(x_multi, params, force_pallas=True)
    jax.block_until_ready(out_multi)
    ref_multi = _reference_forward(x_multi, params)
    assert out_multi.shape == (520, 1)
    assert jnp.allclose(out_multi, ref_multi, atol=1e-4, rtol=1e-4), (
        float(jnp.max(jnp.abs(out_multi - ref_multi))))

    print("KERNEL_OK")
</pallas_src>

<mosaic_0001>
module attributes {stable_mosaic.version = 11 : i64} {
  func.func @_spectrum_kernel(%arg0: i32, %arg1: memref<8x32xf32, #tpu.memory_space<vmem>>, %arg2: memref<32x256xbf16, #tpu.memory_space<vmem>>, %arg3: memref<1x256xf32, #tpu.memory_space<vmem>>, %arg4: memref<256x256xbf16, #tpu.memory_space<vmem>>, %arg5: memref<1x256xf32, #tpu.memory_space<vmem>>, %arg6: memref<1x256xf32, #tpu.memory_space<vmem>>, %arg7: memref<1x1xf32, #tpu.memory_space<vmem>>, %arg8: memref<8x1xf32, #tpu.memory_space<vmem>>) attributes {dimension_semantics = [#tpu.dimension_semantics<parallel>], iteration_bounds = array<i64: 1>, scalar_prefetch = 0 : i64, scratch_operands = 0 : i64, tpu.core_type = #tpu.core_type<tc>, window_params = [{transform_indices = @transform_0, window_bounds = array<i64: 8, 32>}, {pipeline_mode = #tpu.pipeline_mode<synchronous>, transform_indices = @transform_1, window_bounds = array<i64: 32, 256>}, {pipeline_mode = #tpu.pipeline_mode<synchronous>, transform_indices = @transform_2, window_bounds = array<i64: 1, 256>}, {pipeline_mode = #tpu.pipeline_mode<synchronous>, transform_indices = @transform_3, window_bounds = array<i64: 256, 256>}, {pipeline_mode = #tpu.pipeline_mode<synchronous>, transform_indices = @transform_4, window_bounds = array<i64: 1, 256>}, {pipeline_mode = #tpu.pipeline_mode<synchronous>, transform_indices = @transform_5, window_bounds = array<i64: 1, 256>}, {pipeline_mode = #tpu.pipeline_mode<synchronous>, transform_indices = @transform_6, window_bounds = array<i64: 1, 1>}, {transform_indices = @transform_7, window_bounds = array<i64: 8, 1>}]} {
    %c0 = arith.constant 0 : index
    %c0_0 = arith.constant 0 : index
    %0 = vector.load %arg1[%c0, %c0_0] : memref<8x32xf32, #tpu.memory_space<vmem>>, vector<8x32xf32>
    %1 = arith.truncf %0 : vector<8x32xf32> to vector<8x32xbf16>
    %c0_1 = arith.constant 0 : index
    %c0_2 = arith.constant 0 : index
    %2 = vector.load %arg2[%c0_1, %c0_2] : memref<32x256xbf16, #tpu.memory_space<vmem>>, vector<32x256xbf16>
    %cst = arith.constant dense<0.000000e+00> : vector<8x256xf32>
    %3 = tpu.matmul %1, %2, %cst {dimension_numbers = #tpu.dot_dimension_numbers<[1], [0], [0], [1], [0, 0, 1, 1], [], []>} : vector<8x32xbf16>, vector<32x256xbf16>, vector<8x256xf32> -> vector<8x256xf32>
    %c0_3 = arith.constant 0 : index
    %c0_4 = arith.constant 0 : index
    %4 = vector.load %arg3[%c0_3, %c0_4] : memref<1x256xf32, #tpu.memory_space<vmem>>, vector<1x256xf32>
    %5 = vector.broadcast %4 : vector<1x256xf32> to vector<8x256xf32>
    %6 = arith.addf %3, %5 : vector<8x256xf32>
    %cst_5 = arith.constant 0.000000e+00 : f32
    %7 = vector.broadcast %cst_5 : f32 to vector<8x256xf32>
    %8 = arith.maximumf %6, %7 : vector<8x256xf32>
    %9 = arith.truncf %8 : vector<8x256xf32> to vector<8x256xbf16>
    %c0_6 = arith.constant 0 : index
    %c0_7 = arith.constant 0 : index
    %10 = vector.load %arg4[%c0_6, %c0_7] : memref<256x256xbf16, #tpu.memory_space<vmem>>, vector<256x256xbf16>
    %cst_8 = arith.constant dense<0.000000e+00> : vector<8x256xf32>
    %11 = tpu.matmul %9, %10, %cst_8 {dimension_numbers = #tpu.dot_dimension_numbers<[1], [0], [0], [1], [0, 0, 1, 1], [], []>} : vector<8x256xbf16>, vector<256x256xbf16>, vector<8x256xf32> -> vector<8x256xf32>
    %c0_9 = arith.constant 0 : index
    %c0_10 = arith.constant 0 : index
    %12 = vector.load %arg5[%c0_9, %c0_10] : memref<1x256xf32, #tpu.memory_space<vmem>>, vector<1x256xf32>
    %13 = vector.broadcast %12 : vector<1x256xf32> to vector<8x256xf32>
    %14 = arith.addf %11, %13 : vector<8x256xf32>
    %cst_11 = arith.constant 0.000000e+00 : f32
    %15 = vector.broadcast %cst_11 : f32 to vector<8x256xf32>
    %16 = arith.maximumf %14, %15 : vector<8x256xf32>
    %c0_12 = arith.constant 0 : index
    %c0_13 = arith.constant 0 : index
    %17 = vector.load %arg6[%c0_12, %c0_13] : memref<1x256xf32, #tpu.memory_space<vmem>>, vector<1x256xf32>
    %18 = vector.broadcast %17 : vector<1x256xf32> to vector<8x256xf32>
    %19 = arith.mulf %16, %18 : vector<8x256xf32>
    %cst_14 = arith.constant dense<0.000000e+00> : vector<8xf32>
    %20 = vector.multi_reduction <add>, %19, %cst_14 [1] : vector<8x256xf32> to vector<8xf32>
    %21 = vector.shape_cast %20 : vector<8xf32> to vector<8x1xf32>
    %c0_15 = arith.constant 0 : index
    %c0_16 = arith.constant 0 : index
    %22 = vector.load %arg7[%c0_15, %c0_16] : memref<1x1xf32, #tpu.memory_space<vmem>>, vector<1x1xf32>
    %23 = vector.broadcast %22 : vector<1x1xf32> to vector<8x1xf32>
    %24 = arith.addf %21, %23 : vector<8x1xf32>
    %c0_17 = arith.constant 0 : index
    %c0_18 = arith.constant 0 : index
    %25 = vector.load %arg8[%c0_17, %c0_18] : memref<8x1xf32, #tpu.memory_space<vmem>>, vector<8x1xf32>
    tpu.vector_store %arg8[%c0_17, %c0_18], %24 {strides = array<i32>} : memref<8x1xf32, #tpu.memory_space<vmem>>, vector<8x1xf32>,
    return
  }
  func.func @transform_0(%arg0: i32) -> (i32, i32) {
    %c0_i32 = arith.constant 0 : i32
    %c0_i32_0 = arith.constant 0 : i32
    return %arg0, %c0_i32 : i32, i32
  }
  func.func @transform_1(%arg0: i32) -> (i32, i32) {
    %c0_i32 = arith.constant 0 : i32
    %c0_i32_0 = arith.constant 0 : i32
    %c0_i32_1 = arith.constant 0 : i32
    return %c0_i32, %c0_i32_0 : i32, i32
  }
  func.func @transform_2(%arg0: i32) -> (i32, i32) {
    %c0_i32 = arith.constant 0 : i32
    %c0_i32_0 = arith.constant 0 : i32
    %c0_i32_1 = arith.constant 0 : i32
    return %c0_i32, %c0_i32_0 : i32, i32
  }
  func.func @transform_3(%arg0: i32) -> (i32, i32) {
    %c0_i32 = arith.constant 0 : i32
    %c0_i32_0 = arith.constant 0 : i32
    %c0_i32_1 = arith.constant 0 : i32
    return %c0_i32, %c0_i32_0 : i32, i32
  }
  func.func @transform_4(%arg0: i32) -> (i32, i32) {
    %c0_i32 = arith.constant 0 : i32
    %c0_i32_0 = arith.constant 0 : i32
    %c0_i32_1 = arith.constant 0 : i32
    return %c0_i32, %c0_i32_0 : i32, i32
  }
  func.func @transform_5(%arg0: i32) -> (i32, i32) {
    %c0_i32 = arith.constant 0 : i32
    %c0_i32_0 = arith.constant 0 : i32
    %c0_i32_1 = arith.constant 0 : i32
    return %c0_i32, %c0_i32_0 : i32, i32
  }
  func.func @transform_6(%arg0: i32) -> (i32, i32) {
    %c0_i32 = arith.constant 0 : i32
    %c0_i32_0 = arith.constant 0 : i32
    %c0_i32_1 = arith.constant 0 : i32
    return %c0_i32, %c0_i32_0 : i32, i32
  }
  func.func @transform_7(%arg0: i32) -> (i32, i32) {
    %c0_i32 = arith.constant 0 : i32
    %c0_i32_0 = arith.constant 0 : i32
    return %arg0, %c0_i32 : i32, i32
  }
}

</mosaic_0001>

<bundles_post_ra>
// kernel: tpu_custom_call.1
= control target key start
LH: loop header
LB: loop body
LE: loop exit
PB: predicated region body
PF: predicated region fallthrough
CT: control target
= control target key end

     0   :  { %s667_s0 = inlined_call_operand.hbm [shape: f32[8,32], index: 0, kind: input, shape index: {}]   ;;  %s668_s1 = inlined_call_operand.hbm [shape: bf16[32,256], index: 1, kind: input, shape index: {}]   ;;  %s669_s2 = inlined_call_operand.vmem [shape: f32[1,256], index: 2, kind: input, shape index: {}]   ;;  %s670_s3 = inlined_call_operand.hbm [shape: bf16[256,256], index: 3, kind: input, shape index: {}]   ;;  %s671_s4 = inlined_call_operand.vmem [shape: f32[1,256], index: 4, kind: input, shape index: {}]   ;;  %s672_s5 = inlined_call_operand.vmem [shape: f32[1,256], index: 5, kind: input, shape index: {}]   ;;  %s673_s6 = inlined_call_operand.<no memory space> [shape: f32[1,1], index: 6, kind: input, shape index: {}]   ;;  %s674_s7 = inlined_call_operand.vmem [shape: f32[8,1], index: 7, kind: output, shape index: {}]  }
   0x1   :  { %v12_v0 = vstv %s673_s6 }
   0x2   :  { %13 = vst [vmem:[#allocation2] sm:$0x1] %v12_v0 }
   0x3   :  { %14 = vsyncpa [#allocation4], 0 }
   0x4   :  { %15 = vsyncpa [#allocation6], 0  ;;  %s597_s26 = smov [#allocation5]  }
   0x5   :  { %s31_s27 = sshll.u32 %s597_s26, 4  ;;  %s32_s27 = int_to_ptr.vmem [resolvable:$true] %s31_s27 }
   0x6   :  { %s541_s28 = scalar_lea.vmem %s32_s27, 512  ;;  %p546_p1 = scmp.lt.s32.totalorder %s32_s27, %s32_s27 }
   0x7   :  { %p542_p0 = scmp.ne.s32.totalorder %s32_s27, %s541_s28  ;;  %p547_p2 = scmp.lt.s32.totalorder %s541_s28, %s541_s28 }
   0x9   :  { %p548_p3 = por %p547_p2, %p546_p1 }
   0xb   :  { %p549_p4 = pnand %p548_p3, %p542_p0 }
   0xd   :  { %552 = shalt.err (!%p549_p4)
}
   0xe   :  { %s598_s29 = smov 128   ;;  %s599_s30 = smov 8  }
   0xf   :  { %37 = dma.hbm_to_vmem [thread:$0]  %s668_s1, 512, %s32_s27, [#allocation6], %s598_s29, %s598_s29, %s599_s30  }
  0x10   :  { %s600_s6 = smov [#allocation3]   ;;  %s601_s11 = smov [#allocation7]  }
  0x11   :  { %s22_s10 = sshll.u32 %s600_s6, 4  ;;  %s45_s12 = sshll.u32 %s601_s11, 4  ;;  %s23_s10 = int_to_ptr.vmem [resolvable:$true] %s22_s10  ;;  %s46_s12 = int_to_ptr.vmem [resolvable:$true] %s45_s12 }
  0x12   :  { %s561_s13 = scalar_lea.vmem %s23_s10, 128  ;;  %p566_p6 = scmp.lt.s32.totalorder %s23_s10, %s23_s10 }
  0x13   :  { %p562_p5 = scmp.ne.s32.totalorder %s23_s10, %s561_s13  ;;  %p567_p7 = scmp.lt.s32.totalorder %s561_s13, %s561_s13 }
  0x15   :  { %p568_p8 = por %p567_p7, %p566_p6 }
  0x17   :  { %p569_p9 = pnand %p568_p8, %p562_p5 }
  0x19   :  { %572 = shalt.err (!%p569_p9)
}
  0x1a   :  { %25 = dma.hbm_to_vmem [thread:$0]  %s667_s0, 128, %s23_s10, [#allocation4]  }
  0x1b   :  { %s581_s16 = scalar_lea.vmem %s46_s12, 4096  ;;  %p586_p11 = scmp.lt.s32.totalorder %s46_s12, %s46_s12 }
  0x1c   :  { %p582_p10 = scmp.ne.s32.totalorder %s46_s12, %s581_s16  ;;  %p587_p12 = scmp.lt.s32.totalorder %s581_s16, %s581_s16 }
  0x1e   :  { %p588_p13 = por %p587_p12, %p586_p11 }
  0x20   :  { %p589_p0 = pnand %p588_p13, %p582_p10 }
  0x22   :  { %592 = shalt.err (!%p589_p0)
}
  0x23   :  { %51 = dma.hbm_to_vmem [thread:$0]  %s670_s3, 4096, %s46_s12, [#allocation6], %s598_s29, %s598_s29, %s599_s30  }
  0x24   :  { %593 = dma.done.wait [#allocation4], 128  }
  0x25   :  { %594 = vsyncadd [#allocation4], 4294967168 }
  0x26   :  { %595 = dma.done.wait [#allocation6], 4608  }
  0x27   :  { %596 = vsyncadd [#allocation6], 4294962688  ;;  %v602_v1 = vmov 0   ;;  %v479_v2 = vld [vmem:[#allocation5 + $0x14] ss:$8 sps:$4 sm:$0xff]   ;;  %vm106_vm0 = vcmask 261120   ;;  %v76_v40 = vlaneseq }
  0x28   :  { %142 = vmatprep.mubr.bf16.mxu0 %v602_v1  ;;  %v481_v3 = vld [vmem:[#allocation5 + $0x10] ss:$8 sps:$4 sm:$0xff]   ;;  %122 = vmatprep.subr.bf16.mxu0 %v479_v2  ;;  %v482_v4 = vld [vmem:[#allocation5 + $0x4] ss:$8 sps:$4 sm:$0xff]   ;;  %v484_v5 = vld [vmem:[#allocation5] ss:$8 sps:$4 sm:$0xff]  }
  0x29   :  { %v68_v6 = vld [vmem:[#allocation3] sm:$0xff]  ;;  %123 = vmatpush1.bf16.msra.mxu0 %v481_v3  ;;  %v488_v9 = vld [vmem:[#allocation7 + $0x64] ss:$8 sps:$4 sm:$0xff]   ;;  %v490_v11 = vld [vmem:[#allocation7 + $0x60] ss:$8 sps:$4 sm:$0xff]   ;;  %v77_v41 = vshrl.u32 %v76_v40, 7 }
  0x2a   :  { %v485_v7 = vld [vmem:[#allocation7 + $0x74] ss:$8 sps:$4 sm:$0xff]   ;;  %124 = vmatprep.subr.bf16.mxu0 %v482_v4  ;;  %v487_v8 = vld [vmem:[#allocation7 + $0x70] ss:$8 sps:$4 sm:$0xff]   ;;  %v69_v10 = vpack.c.bf16 %v68_v6, %v68_v6  ;;  %v494_v14 = vld [vmem:[#allocation7 + $0x44] ss:$8 sps:$4 sm:$0xff]  }
  0x2b   :  { %359 = vmatprep.subr.bf16.mxu1 %v485_v7  ;;  %v491_v12 = vld [vmem:[#allocation7 + $0x54] ss:$8 sps:$4 sm:$0xff]   ;;  %v493_v13 = vld [vmem:[#allocation7 + $0x50] ss:$8 sps:$4 sm:$0xff]   ;;  %v496_v15 = vld [vmem:[#allocation7 + $0x40] ss:$8 sps:$4 sm:$0xff]  }
  0x2c   :  { %360 = vmatpush1.bf16.msra.mxu1 %v487_v8  ;;  %v497_v16 = vld [vmem:[#allocation7 + $0x34] ss:$8 sps:$4 sm:$0xff]   ;;  %v499_v17 = vld [vmem:[#allocation7 + $0x30] ss:$8 sps:$4 sm:$0xff]   ;;  %v500_v18 = vld [vmem:[#allocation7 + $0x24] ss:$8 sps:$4 sm:$0xff]  }
  0x2d   :  { %125 = vmatpush1.bf16.msra.mxu0 %v484_v5  ;;  %361 = vmatprep.subr.bf16.mxu1 %v488_v9  ;;  %v502_v19 = vld [vmem:[#allocation7 + $0x20] ss:$8 sps:$4 sm:$0xff]   ;;  %v503_v20 = vld [vmem:[#allocation7 + $0x14] ss:$8 sps:$4 sm:$0xff]   ;;  %v505_v21 = vld [vmem:[#allocation7 + $0x10] ss:$8 sps:$4 sm:$0xff]  }
  0x2e   :  { %v506_v22 = vld [vmem:[#allocation7 + $0x4] ss:$8 sps:$4 sm:$0xff]   ;;  %v508_v23 = vld [vmem:[#allocation7] ss:$8 sps:$4 sm:$0xff]   ;;  %v509_v24 = vld [vmem:[#allocation7 + $0xf4] ss:$8 sps:$4 sm:$0xff]  }
  0x2f   :  { %v511_v25 = vld [vmem:[#allocation7 + $0xf0] ss:$8 sps:$4 sm:$0xff]   ;;  %v512_v26 = vld [vmem:[#allocation7 + $0xe4] ss:$8 sps:$4 sm:$0xff]   ;;  %v514_v27 = vld [vmem:[#allocation7 + $0xe0] ss:$8 sps:$4 sm:$0xff]  }
  0x30   :  { %439 = vmatmul.mubr.msk.bf16.vlgmr.msra.gmra.mxu0 %vm106_vm0, %v69_v10  ;;  %362 = vmatpush1.bf16.msra.mxu1 %v490_v11  ;;  %v515_v28 = vld [vmem:[#allocation7 + $0xd4] ss:$8 sps:$4 sm:$0xff]   ;;  %v517_v29 = vld [vmem:[#allocation7 + $0xd0] ss:$8 sps:$4 sm:$0xff]   ;;  %v518_v30 = vld [vmem:[#allocation7 + $0xc4] ss:$8 sps:$4 sm:$0xff]  }
  0x31   :  { %363 = vmatprep.subr.bf16.mxu1 %v491_v12  ;;  %v520_v31 = vld [vmem:[#allocation7 + $0xc0] ss:$8 sps:$4 sm:$0xff]   ;;  %v521_v32 = vld [vmem:[#allocation7 + $0xb4] ss:$8 sps:$4 sm:$0xff]   ;;  %v523_v33 = vld [vmem:[#allocation7 + $0xb0] ss:$8 sps:$4 sm:$0xff]  }
  0x32   :  { %v524_v34 = vld [vmem:[#allocation7 + $0xa4] ss:$8 sps:$4 sm:$0xff]   ;;  %v526_v35 = vld [vmem:[#allocation7 + $0xa0] ss:$8 sps:$4 sm:$0xff]   ;;  %v527_v36 = vld [vmem:[#allocation7 + $0x94] ss:$8 sps:$4 sm:$0xff]  }
  0x33   :  { %v529_v37 = vld [vmem:[#allocation7 + $0x90] ss:$8 sps:$4 sm:$0xff]   ;;  %v530_v38 = vld [vmem:[#allocation7 + $0x84] ss:$8 sps:$4 sm:$0xff]   ;;  %v532_v39 = vld [vmem:[#allocation7 + $0x80] ss:$8 sps:$4 sm:$0xff]  }
  0x34   :  { %364 = vmatpush1.bf16.msra.mxu1 %v493_v13  ;;  %v78_v42 = vsub.s32 0, %v77_v41  ;;  %v74_v43 = vld [vmem:[%s669_s2] sm:$0x3]  ;;  %v82_v44 = vsub.s32 1, %v77_v41  ;;  %vm427_vm1 = vcmask 7168  }
  0x35   :  { %365 = vmatprep.subr.bf16.mxu1 %v494_v14  ;;  %v187_v57 = vld [vmem:[%s671_s4] sm:$0x3] }
  0x36   :  { %v79_v45 = vrot.slane %v74_v43, %v78_v42  ;;  %v83_v46 = vrot.slane %v74_v43, %v82_v44  ;;  %v192_v58 = vrot.slane %v187_v57, %v78_v42  ;;  %v196_v59 = vrot.slane %v187_v57, %v82_v44  ;;  %v402_v61 = vld [vmem:[%s672_s5] sm:$0x3] }
  0x37   :  { %v407_v2 = vrot.slane %v402_v61, %v78_v42  ;;  %v411_v3 = vrot.slane %v402_v61, %v82_v44  ;;  %v472_v10 = vld [vmem:[#allocation2] ss:$0 sm:$0xff] }
  0x38   :  { %366 = vmatpush1.bf16.msra.mxu1 %v496_v15 }
  0x39   :  { %367 = vmatprep.subr.bf16.mxu1 %v497_v16 }
  0x3c   :  { %368 = vmatpush1.bf16.msra.mxu1 %v499_v17 }
  0x3d   :  { %369 = vmatprep.subr.bf16.mxu1 %v500_v18 }
  0x40   :  { %370 = vmatpush1.bf16.msra.mxu1 %v502_v19 }
  0x41   :  { %371 = vmatprep.subr.bf16.mxu1 %v503_v20 }
  0x44   :  { %372 = vmatpush1.bf16.msra.mxu1 %v505_v21 }
  0x45   :  { %373 = vmatprep.subr.bf16.mxu1 %v506_v22 }
  0x48   :  { %374 = vmatpush1.bf16.msra.mxu1 %v508_v23 }
  0x49   :  { %375 = vmatprep.subr.bf16.mxu1 %v509_v24 }
  0x4c   :  { %376 = vmatpush2.bf16.msra.mxu1 %v511_v25 }
  0x4d   :  { %377 = vmatprep.subr.bf16.mxu1 %v512_v26 }
  0x50   :  { %378 = vmatpush2.bf16.msra.mxu1 %v514_v27 }
  0x51   :  { %379 = vmatprep.subr.bf16.mxu1 %v515_v28 }
  0x54   :  { %380 = vmatpush2.bf16.msra.mxu1 %v517_v29 }
  0x55   :  { %381 = vmatprep.subr.bf16.mxu1 %v518_v30 }
  0x58   :  { %382 = vmatpush2.bf16.msra.mxu1 %v520_v31 }
  0x59   :  { %383 = vmatprep.subr.bf16.mxu1 %v521_v32 }
  0x5c   :  { %384 = vmatpush2.bf16.msra.mxu1 %v523_v33 }
  0x5d   :  { %385 = vmatprep.subr.bf16.mxu1 %v524_v34 }
  0x60   :  { %386 = vmatpush2.bf16.msra.mxu1 %v526_v35 }
  0x61   :  { %387 = vmatprep.subr.bf16.mxu1 %v527_v36 }
  0x64   :  { %388 = vmatpush2.bf16.msra.mxu1 %v529_v37 }
  0x65   :  { %389 = vmatprep.subr.bf16.mxu1 %v530_v38 }
  0x68   :  { %390 = vmatpush2.bf16.msra.mxu1 %v532_v39 }
  0xf0   :  { %v144_v47 = vpop.f32.mrf.mxu0 }
  0xf1   :  { %v145_v48 = vadd.f32 %v144_v47, %v79_v45 }
  0xf2   :  { %v146_v49 = vpop.f32.mrf.mxu0 }
  0xf3   :  { %v147_v50 = vadd.f32 %v146_v49, %v83_v46  ;;  %v151_v51 = vmax.f32 %v145_v48, 0.0 }
  0xf4   :  { %v148_v52 = vpop.f32.mrf.mxu0 }
  0xf5   :  { %v152_v53 = vmax.f32 %v147_v50, 0.0  ;;  %v153_v56 = vpack.c.bf16 %v151_v51, %v151_v51 }
  0xf6   :  { %v149_v54 = vpop.f32.mrf.mxu0 }
  0xf7   :  { %v154_v55 = vpack.c.bf16 %v152_v53, %v152_v53 }
  0xf9   :  { %391 = vmatprep.mubr.bf16.mxu1 %v154_v55 }
  0xfa   :  { %392 = vmatmul.mubr.bf16.vlgmr.msra.gmra.mxu1 %v153_v56 }
 0x1ba   :  { %v393_v60 = vpop.f32.mrf.mxu1 }
 0x1bb   :  { %v394_v62 = vadd.f32 %v393_v60, %v192_v58 }
 0x1bc   :  { %v395_v63 = vpop.f32.mrf.mxu1 }
 0x1bd   :  { %v400_v0 = vmax.f32 %v394_v62, 0.0  ;;  %v396_v1 = vadd.f32 %v395_v63, %v196_v59 }
 0x1be   :  { %v397_v4 = vpop.f32.mrf.mxu1 }
 0x1bf   :  { %v401_v5 = vmax.f32 %v396_v1, 0.0  ;;  %v414_v7 = vmul.f32 %v407_v2, %v400_v0 }
 0x1c0   :  { %v398_v6 = vpop.f32.mrf.mxu1 }
 0x1c1   :  { %v415_v8 = vmul.f32 %v411_v3, %v401_v5 }
 0x1c3   :  { %v416_v9 = vadd.f32 %v415_v8, %v414_v7 }
 0x1c5   :  { %417 = vadd.xlane.f32.xlu0 %v416_v9 }
 0x24e   :  { %v418_v11 = vpop.xlane.xlu0 %417 }
 0x24f   :  { %v426_v12 = vadd.f32 %v472_v10, %v418_v11 }
 0x251   :  { %428 = vst.msk [vmem:[%s674_s7] sm:$0xff] %vm427_vm1, %v426_v12 }
 0x252   :  { %433 = vsyncpa [#allocation4], 1 }
 0x253   :  { %434 = vsyncpa [#allocation6], 1 }

</bundles_post_ra>
